<compile_context>
chip_gen: v7x
topology: tpu7x:2x2x1
jax: 0.10.0
libtpu: 0.0.40
codegen_flags: <defaults>
</compile_context>

<pallas_src>
import functools

import jax
import jax.numpy as jnp
from jax import lax
from jax.experimental import pallas as pl
from jax.experimental.pallas import tpu as pltpu


def _round_up(x: int, m: int) -> int:
    return ((x + m - 1) // m) * m


def _lsce_kernel(x_ref, tgt_ref, out_ref, *, smoothing: float):
    confidence = 1.0 - smoothing

    logits = x_ref[...].astype(jnp.float32)                 # (tm, C)
    tm, C = logits.shape

    # Numerically stable LSE along the class (lane) axis.
    row_max = jnp.max(logits, axis=-1, keepdims=True)        # (tm, 1)
    lse = jnp.log(jnp.sum(jnp.exp(logits - row_max),
                          axis=-1, keepdims=True))           # (tm, 1)

    # Gather x[row, target[row]] via a one-hot mask on the RAW logits
    # (no logprobs materialization needed).
    col_ids = lax.broadcasted_iota(jnp.int32, (tm, C), 1)
    tgt = tgt_ref[...]                                        # (tm, 1) int32
    gathered = jnp.sum(jnp.where(col_ids == tgt, logits, 0.0),
                       axis=-1, keepdims=True)                # (tm, 1)

    sum_x = jnp.sum(logits, axis=-1, keepdims=True)           # (tm, 1)

    # per_row = confidence * nll + smoothing * smooth
    #         = (row_max + lse) - confidence * x[target] - smoothing * mean(x)
    per_row = (row_max + lse) - (confidence * gathered
                                 + (smoothing / float(C)) * sum_x)

    out_ref[...] = per_row.astype(out_ref.dtype)


def label_smoothing_cross_entropy(x, target, smoothing: float = 0.1, tm: int | None = None):
    """x: (N, C) float logits; target: (N,) integer class indices. Returns scalar f32."""
    assert smoothing < 1.0
    N, C = x.shape
    bytes_per_row = 4 * C  # f32 inside the kernel

    if tm is None:
        # ~3 MiB per logits block; conservative estimate of total VMEM use is
        # ~2x (double buffer) + a few block-sized elementwise temporaries, which
        # stays comfortably under the 32 MiB scoped limit we request below.
        per_block_budget = 3 * 1024 * 1024
        tm = per_block_budget // bytes_per_row
        tm = max(8, min(2048, (tm // 8) * 8))
    else:
        tm = max(8, (int(tm) // 8) * 8)

    # Don't use a tile larger than the (padded) batch.
    tm = min(tm, _round_up(N, 8))

    N_pad = _round_up(N, tm)
    if N_pad != N:
        x = jnp.pad(x, ((0, N_pad - N), (0, 0)))
        target = jnp.pad(target, (0, N_pad - N))

    tgt2d = target.astype(jnp.int32).reshape(N_pad, 1)
    kernel = functools.partial(_lsce_kernel, smoothing=float(smoothing))

    per_row = pl.pallas_call(
        kernel,
        out_shape=jax.ShapeDtypeStruct((N_pad, 1), jnp.float32),
        grid_spec=pltpu.PrefetchScalarGridSpec(
            num_scalar_prefetch=0,
            grid=(N_pad // tm,),
            in_specs=[
                pl.BlockSpec((tm, C), lambda i: (i, 0)),
                pl.BlockSpec((tm, 1), lambda i: (i, 0)),
            ],
            out_specs=pl.BlockSpec((tm, 1), lambda i: (i, 0)),
        ),
        compiler_params=pltpu.CompilerParams(
            dimension_semantics=("parallel",),      # each tile writes its own rows
            vmem_limit_bytes=32 * 1024 * 1024,      # raise v5e's 16 MiB default
        ),
    )(x, tgt2d)

    # Final reduction (mean over the real batch) in the wrapper.
    return (jnp.sum(per_row[:N, 0]) / jnp.float32(N)).astype(jnp.float32)


def _reference(x, target, smoothing=0.1):
    confidence = 1.0 - smoothing
    logprobs = jax.nn.log_softmax(x.astype(jnp.float32), axis=-1)
    nll = -jnp.take_along_axis(logprobs, target[:, None], axis=-1)[:, 0]
    smooth = -jnp.mean(logprobs, axis=-1)
    return jnp.mean(confidence * nll + smoothing * smooth)


if __name__ == "__main__":
    key = jax.random.PRNGKey(0)
    kx, kt = jax.random.split(key)

    # Small test: N not a multiple of tm exercises the padding + multi-tile path.
    N, C = 40, 128
    x = jax.random.normal(kx, (N, C), dtype=jnp.float32)
    target = jax.random.randint(kt, (N,), 0, C, dtype=jnp.int32)

    out = label_smoothing_cross_entropy(x, target, smoothing=0.1, tm=16)
    out = jax.block_until_ready(out)

    ref = _reference(x, target, smoothing=0.1)
    assert jnp.allclose(out, ref, atol=1e-5, rtol=1e-5), (out, ref)

    print("KERNEL_OK")
</pallas_src>

<mosaic_0001>
module attributes {stable_mosaic.version = 11 : i64} {
  func.func @_lsce_kernel(%arg0: i32, %arg1: memref<16x128xf32, #tpu.memory_space<vmem>>, %arg2: memref<16x1xi32, #tpu.memory_space<vmem>>, %arg3: memref<16x1xf32, #tpu.memory_space<vmem>>) attributes {dimension_semantics = [#tpu.dimension_semantics<parallel>], iteration_bounds = array<i64: 3>, scalar_prefetch = 0 : i64, scratch_operands = 0 : i64, tpu.core_type = #tpu.core_type<tc>, window_params = [{transform_indices = @transform_0, window_bounds = array<i64: 16, 128>}, {transform_indices = @transform_1, window_bounds = array<i64: 16, 1>}, {transform_indices = @transform_2, window_bounds = array<i64: 16, 1>}]} {
    %c0 = arith.constant 0 : index
    %c0_0 = arith.constant 0 : index
    %0 = vector.load %arg1[%c0, %c0_0] : memref<16x128xf32, #tpu.memory_space<vmem>>, vector<16x128xf32>
    %cst = arith.constant dense<0xFF800000> : vector<16xf32>
    %1 = vector.multi_reduction <maximumf>, %0, %cst [1] : vector<16x128xf32> to vector<16xf32>
    %2 = vector.shape_cast %1 : vector<16xf32> to vector<16x1xf32>
    %3 = vector.broadcast %2 : vector<16x1xf32> to vector<16x128xf32>
    %4 = arith.subf %0, %3 : vector<16x128xf32>
    %5 = math.exp %4 : vector<16x128xf32>
    %cst_1 = arith.constant dense<0.000000e+00> : vector<16xf32>
    %6 = vector.multi_reduction <add>, %5, %cst_1 [1] : vector<16x128xf32> to vector<16xf32>
    %7 = vector.shape_cast %6 : vector<16xf32> to vector<16x1xf32>
    %8 = math.log %7 : vector<16x1xf32>
    %9 = tpu.iota {dimensions = array<i32: 1>} : vector<16x128xi32>
    %c0_2 = arith.constant 0 : index
    %c0_3 = arith.constant 0 : index
    %10 = vector.load %arg2[%c0_2, %c0_3] : memref<16x1xi32, #tpu.memory_space<vmem>>, vector<16x1xi32>
    %11 = vector.broadcast %10 : vector<16x1xi32> to vector<16x128xi32>
    %12 = arith.cmpi eq, %9, %11 : vector<16x128xi32>
    %cst_4 = arith.constant 0.000000e+00 : f32
    %13 = vector.broadcast %cst_4 : f32 to vector<16x128xf32>
    %14 = arith.select %12, %0, %13 : vector<16x128xi1>, vector<16x128xf32>
    %cst_5 = arith.constant dense<0.000000e+00> : vector<16xf32>
    %15 = vector.multi_reduction <add>, %14, %cst_5 [1] : vector<16x128xf32> to vector<16xf32>
    %16 = vector.shape_cast %15 : vector<16xf32> to vector<16x1xf32>
    %cst_6 = arith.constant dense<0.000000e+00> : vector<16xf32>
    %17 = vector.multi_reduction <add>, %0, %cst_6 [1] : vector<16x128xf32> to vector<16xf32>
    %18 = vector.shape_cast %17 : vector<16xf32> to vector<16x1xf32>
    %19 = arith.addf %2, %8 : vector<16x1xf32>
    %cst_7 = arith.constant 0.899999976 : f32
    %20 = vector.broadcast %cst_7 : f32 to vector<16x1xf32>
    %21 = arith.mulf %20, %16 : vector<16x1xf32>
    %cst_8 = arith.constant 7.812500e-04 : f32
    %22 = vector.broadcast %cst_8 : f32 to vector<16x1xf32>
    %23 = arith.mulf %22, %18 : vector<16x1xf32>
    %24 = arith.addf %21, %23 : vector<16x1xf32>
    %25 = arith.subf %19, %24 : vector<16x1xf32>
    %c0_9 = arith.constant 0 : index
    %c0_10 = arith.constant 0 : index
    %26 = vector.load %arg3[%c0_9, %c0_10] : memref<16x1xf32, #tpu.memory_space<vmem>>, vector<16x1xf32>
    tpu.vector_store %arg3[%c0_9, %c0_10], %25 {strides = array<i32>} : memref<16x1xf32, #tpu.memory_space<vmem>>, vector<16x1xf32>,
    return
  }
  func.func @transform_0(%arg0: i32) -> (i32, i32) {
    %c0_i32 = arith.constant 0 : i32
    %c0_i32_0 = arith.constant 0 : i32
    return %arg0, %c0_i32 : i32, i32
  }
  func.func @transform_1(%arg0: i32) -> (i32, i32) {
    %c0_i32 = arith.constant 0 : i32
    %c0_i32_0 = arith.constant 0 : i32
    return %arg0, %c0_i32 : i32, i32
  }
  func.func @transform_2(%arg0: i32) -> (i32, i32) {
    %c0_i32 = arith.constant 0 : i32
    %c0_i32_0 = arith.constant 0 : i32
    return %arg0, %c0_i32 : i32, i32
  }
}

</mosaic_0001>

<bundles_post_ra>
// kernel: tpu_custom_call.1
= control target key start
LH: loop header
LB: loop body
LE: loop exit
PB: predicated region body
PF: predicated region fallthrough
CT: control target
= control target key end

     0   :  { %s348_s9 = smov 0   ;;  %s373_s0 = inlined_call_operand.vmem [shape: f32[48,128], index: 0, kind: input, shape index: {}]   ;;  %s374_s1 = inlined_call_operand.vmem [shape: s32[48,1], index: 1, kind: input, shape index: {}]   ;;  %s375_s2 = inlined_call_operand.vmem [shape: f32[48,1], index: 2, kind: output, shape index: {}]  }
   0x1 LB: > { %s292_s10 = sadd.s32 4294967295, %s330_s9   ;;  %p296_p0 = scmp.ge.s32.totalorder %s330_s9, 1  ;;  %s330_s9 = sphi %s348_s9, %s12_s9  }
   0x2   : > { %p124_p1 = scmp.lt.s32.totalorder %s330_s9, 4 }
   0x4   : > { %p125_p2 = pnand %p296_p0, %p124_p1 }
   0x5   : > { %s297_s11 = sshll.u32 (!%p125_p2), %s292_s10, 1  ;;  %v332_v0 = vmov (!%p125_p2), 0   ;;  %v189_v10 = vlaneseq (!%p125_p2)  ;;  %vm221_vm2 = vcmask (!%p125_p2), 7168  }
   0x6   : > { %128 = sbr.rel (%p125_p2) target bundleno = 339 (0x153), region = 28  ;;  %p152_p3 = scmp.lt.s32.totalorder (!%p125_p2), %s297_s11, 5  ;;  %314 = vset.pattern.permute.xlu1 (!%p125_p2), %v332_v0  ;;  %315 = vset.pattern.permute.xlu0 (!%p125_p2), %v332_v0 }
   0x7   : > { %v190_v12 = vand.u32 (!%p125_p2), 127, %v189_v10 }
   0xd   : > { %s377_s11 = smov (!%p152_p3, %s297_s11), 5 }
   0xe   : > { %s356_s12 = sshll.u32 %s377_s11, 3 }
   0xf   : > { %s155_s15 = scalar_lea.vmem %s373_s0, %s356_s12  ;;  %s161_s18 = scalar_lea.vmem %s374_s1, %s356_s12 }
  0x10   : > { %v169_v1 = vld [vmem:[%s155_s15] sm:$0xff]  ;;  %v170_v3 = vld [vmem:[%s155_s15 + $0x8] sm:$0xff]  ;;  %s167_s21 = scalar_lea.vmem %s375_s2, %s356_s12 }
  0x11   : > { %171 = vmax.xlane.f32.xlu0 %v169_v1  ;;  %v191_v2 = vld [vmem:[%s161_s18] sm:$0xff]  ;;  %v192_v4 = vld [vmem:[%s161_s18 + $0x8] sm:$0xff] }
  0x12   : > { %194 = vperm.xlu1 %314, %v191_v2  }
  0x15   : > { %173 = vmax.xlane.f32.xlu0 %v170_v3 }
  0x16   : > { %197 = vperm.xlu1 %314, %v192_v4  }
  0x91   : > { %v195_v13 = vpop.permute.xlu1 %194 }
  0x92   : > { %vm199_vm0 = vcmp.eq.s32.totalorder %v190_v12, %v195_v13 }
  0x93   : > { %v201_v15 = vsel %vm199_vm0, %v169_v1, 0.0 }
  0x95   : > { %v198_v17 = vpop.permute.xlu1 %197 }
  0x96   : > { %vm200_vm1 = vcmp.eq.s32.totalorder %v190_v12, %v198_v17 }
  0x97   : > { %v202_v18 = vsel %vm200_vm1, %v170_v3, 0.0 }
  0x9e   : > { %v172_v5 = vpop.xlane.xlu0 %171 }
  0x9f   : > { %v175_v6 = vsub.f32 %v169_v1, %v172_v5 }
  0xa1   : > { %v177_v7 = vmul.f32 1.442695, %v175_v6 }
  0xa2   : > { %v174_v8 = vpop.xlane.xlu0 %173 }
  0xa3   : > { %316 = vpow2.f32 %v177_v7  ;;  %v176_v9 = vsub.f32 %v170_v3, %v174_v8 }
  0xa5   : > { %v179_v11 = vmul.f32 1.442695, %v176_v9 }
  0xa7   : > { %318 = vpow2.f32 %v179_v11 }
  0xad   : > { %v317_v14 = vpop.eup %316 }
  0xae   : > { %181 = vadd.xlane.f32.xlu0 %v317_v14 }
  0xb1   : > { %v319_v16 = vpop.eup %318 }
  0xb2   : > { %183 = vadd.xlane.f32.xlu1 %v319_v16  ;;  %203 = vadd.xlane.f32.xlu0 %v201_v15 }
  0xb6   : > { %207 = vadd.xlane.f32.xlu0 %v169_v1 }
  0xba   : > { %205 = vadd.xlane.f32.xlu0 %v202_v18 }
  0xbe   : > { %209 = vadd.xlane.f32.xlu0 %v170_v3 }
 0x13b   : > { %v182_v19 = vpop.xlane.xlu0 %181 }
 0x13c   : > { %320 = vlog2.f32 %v182_v19 }
 0x13f   : > { %v184_v20 = vpop.xlane.xlu1 %183  ;;  %v204_v21 = vpop.xlane.xlu0 %203 }
 0x140   : > { %322 = vlog2.f32 %v184_v20  ;;  %v213_v26 = vmul.f32 0.9, %v204_v21 }
 0x143   : > { %v208_v22 = vpop.xlane.xlu0 %207 }
 0x144   : > { %v215_v23 = vmul.f32 0.00078125, %v208_v22 }
 0x146   : > { %v321_v24 = vpop.eup %320  ;;  %v217_v29 = vadd.f32 %v215_v23, %v213_v26 }
 0x147   : > { %v186_v25 = vmul.f32 0.6931472, %v321_v24  ;;  %v206_v27 = vpop.xlane.xlu0 %205 }
 0x148   : > { %v214_v34 = vmul.f32 0.9, %v206_v27 }
 0x149   : > { %v211_v28 = vadd.f32 %v186_v25, %v172_v5 }
 0x14a   : > { %v323_v30 = vpop.eup %322 }
 0x14b   : > { %v188_v31 = vmul.f32 0.6931472, %v323_v30  ;;  %v219_v32 = vsub.f32 %v211_v28, %v217_v29  ;;  %v210_v33 = vpop.xlane.xlu0 %209 }
 0x14c   : > { %v216_v35 = vmul.f32 0.00078125, %v210_v33 }
 0x14d   : > { %v212_v36 = vadd.f32 %v188_v31, %v174_v8  ;;  %222 = vst.msk [vmem:[%s167_s21] sm:$0xff] %vm221_vm2, %v219_v32 }
 0x14e   : > { %v218_v37 = vadd.f32 %v216_v35, %v214_v34 }
 0x150   : > { %v220_v38 = vsub.f32 %v212_v36, %v218_v37 }
 0x152   : > { %223 = vst.msk [vmem:[%s167_s21 + $0x8] sm:$0xff] %vm221_vm2, %v220_v38 }
 0x153 PF: > { %s12_s9 = sadd.s32 1, %s330_s9  }
 0x154   : > { %p9_p4 = scmp.ge.s32.totalorder %s12_s9, 5  }
 0x156   :  { %11 = sbr.rel (!%p9_p4) target bundleno = 1 (0x1), region = 61 }

</bundles_post_ra>
